<compile_context>
chip_gen: v7x
topology: tpu7x:2x2x1
jax: 0.10.0
libtpu: 0.0.40
codegen_flags: <defaults>
</compile_context>

<pallas_src>
import jax
import jax.numpy as jnp
from jax import lax
from jax.experimental import pallas as pl
from jax.experimental.pallas import tpu as pltpu

LEAKY_SLOPE = 0.2


def _fused_conv3d_kernel(x_ref, w_ref, b_ref, o_ref, acc_ref):
    # x_ref  : (1, 1, TM, K)     bf16  folded (kh*kw*Cin) patches of depth plane d+a
    # w_ref  : (kd, K, Cpad)     bf16  spectral-normalized weight, VMEM-resident (hoisted)
    # b_ref  : (1, Cpad)         f32
    # o_ref  : (1, 1, TM, Cpad)  bf16  written only on the last depth tap
    # acc_ref: (TM, Cpad)        f32   scratch, resident across the kd grid axis
    a = pl.program_id(3)

    @pl.when(a == 0)
    def _():
        acc_ref[...] = jnp.zeros_like(acc_ref)

    # One MXU matmul per depth tap: (TM, K) x (K, Cpad) -> f32 accumulate.
    acc_ref[...] += jnp.dot(x_ref[0, 0], w_ref[a],
                            preferred_element_type=jnp.float32)

    @pl.when(a == pl.num_programs(3) - 1)
    def _():
        y = acc_ref[...] + b_ref[...]                 # bias
        y = jnp.where(y >= 0, y, LEAKY_SLOPE * y)     # LeakyReLU(0.2)
        o_ref[0, 0] = y.astype(o_ref.dtype)


def spectral_sigma(weight, n_power_iter=8):
    """Spectral-norm estimate of weight reshaped to (Cout, -1), power iteration."""
    Cout = weight.shape[0]
    wmat = weight.reshape(Cout, -1).astype(jnp.float32)
    u0 = jnp.ones((Cout,), jnp.float32) / jnp.sqrt(jnp.float32(Cout))

    def body(_, u):
        v = wmat.T @ u
        v = v / (jnp.linalg.norm(v) + 1e-12)
        u = wmat @ v
        u = u / (jnp.linalg.norm(u) + 1e-12)
        return u

    u = lax.fori_loop(0, n_power_iter, body, u0)
    v = wmat.T @ u
    v = v / (jnp.linalg.norm(v) + 1e-12)
    return u @ (wmat @ v)


def vanilla_conv_forward(x_ncdhw, weight, bias, *, stride=1, padding=1):
    """VanillaConv forward: spectral-normalized Conv3d + LeakyReLU(0.2)."""
    assert stride == 1, "fused Pallas path supports stride=1 (module default)"
    Cout, Cin, kd, kh, kw = weight.shape
    B, C, D, H, W = x_ncdhw.shape
    assert C == Cin

    # ----- glue (plain JAX): spectral norm of the weight -----
    sigma = spectral_sigma(weight)
    w_sn = (weight / sigma).astype(jnp.float32)

    # ----- glue (plain JAX): NCDHW -> NDHWC, spatial zero-pad -----
    p = padding
    x = jnp.transpose(x_ncdhw, (0, 2, 3, 4, 1))                       # NDHWC
    x_pad = jnp.pad(x, ((0, 0), (p, p), (p, p), (p, p), (0, 0)))
    Dp, Hp, Wp = D + 2 * p, H + 2 * p, W + 2 * p
    Dout, Hout, Wout = Dp - kd + 1, Hp - kh + 1, Wp - kw + 1
    M0 = Hout * Wout
    K = kh * kw * Cin

    # Per-depth-plane im2col: fold the kh*kw in-plane taps + Cin into the
    # contraction dim (bf16, ~kh*kw x the input -> one dense MXU dot per tap).
    taps = [x_pad[:, :, bb:bb + Hout, cc:cc + Wout, :]
            for bb in range(kh) for cc in range(kw)]                  # (B,Dp,Hout,Wout,Cin)
    x_fold = jnp.stack(taps, axis=-2)                                 # (B,Dp,Hout,Wout,kh*kw,Cin)
    x_fold = x_fold.reshape(B, Dp, M0, K).astype(jnp.bfloat16)

    # ----- M tiling (keeps acc + blocks small; sized for v7x's 64 MiB VMEM) -----
    TM_CAP = 1024
    if M0 <= TM_CAP:
        TM, Mpad = M0, M0
    else:
        TM = TM_CAP                                                   # multiple of 8
        Mpad = ((M0 + TM - 1) // TM) * TM
        x_fold = jnp.pad(x_fold, ((0, 0), (0, 0), (0, Mpad - M0), (0, 0)))
    grid_m = Mpad // TM

    # Lane-dense output channels.
    # TODO(synk): for tiny Cout (e.g. 8) this writes mostly padding; a masked
    # Cout-wide store could trade a few vst.msk for ~16x less output HBM traffic.
    Cpad = ((Cout + 127) // 128) * 128
    w_taps = jnp.transpose(w_sn, (2, 3, 4, 1, 0)).reshape(kd, K, Cout)
    w_taps = jnp.pad(w_taps, ((0, 0), (0, 0), (0, Cpad - Cout))).astype(jnp.bfloat16)
    b_row = jnp.pad(bias.astype(jnp.float32), (0, Cpad - Cout)).reshape(1, Cpad)

    # VMEM budget: double-buffered x/out blocks + resident weight + f32 acc.
    vmem_bytes = (2 * TM * K * 2            # x, 2 buffers, bf16
                  + kd * K * Cpad * 2       # weight, resident
                  + Cpad * 4                # bias
                  + 2 * TM * Cpad * 2       # out, 2 buffers, bf16
                  + TM * Cpad * 4)          # acc scratch
    vmem_limit = int(min(max(int(1.5 * vmem_bytes) + (4 << 20), 16 << 20), 48 << 20))

    flops = 2 * B * Dout * Mpad * (kd * K) * Cpad
    bytes_accessed = (B * Dout * grid_m * kd * TM * K * 2   # x reads (each plane kd times)
                      + kd * K * Cpad * 2                   # weight (resident)
                      + B * Dout * Mpad * Cpad * 2)         # bf16 output writeback

    out = pl.pallas_call(
        _fused_conv3d_kernel,
        out_shape=jax.ShapeDtypeStruct((B, Dout, Mpad, Cpad), jnp.bfloat16),
        grid=(B, Dout, grid_m, kd),
        in_specs=[
            pl.BlockSpec((1, 1, TM, K), lambda b, d, m, a: (b, d + a, m, 0)),
            pl.BlockSpec((kd, K, Cpad), lambda b, d, m, a: (0, 0, 0)),   # hoisted weight
            pl.BlockSpec((1, Cpad), lambda b, d, m, a: (0, 0)),
        ],
        out_specs=pl.BlockSpec((1, 1, TM, Cpad), lambda b, d, m, a: (b, d, m, 0)),
        scratch_shapes=[pltpu.VMEM((TM, Cpad), jnp.float32)],
        compiler_params=pltpu.CompilerParams(
            dimension_semantics=("parallel", "parallel", "parallel", "arbitrary"),
            vmem_limit_bytes=vmem_limit),
        cost_estimate=pl.CostEstimate(flops=flops, transcendentals=0,
                                      bytes_accessed=bytes_accessed),
    )(x_fold, w_taps, b_row)

    out = out[:, :, :M0, :Cout].astype(jnp.float32)
    out = out.reshape(B, Dout, Hout, Wout, Cout)
    return jnp.transpose(out, (0, 4, 1, 2, 3))                        # back to NCDHW


def _reference_forward(x_ncdhw, weight, bias, *, stride=1, padding=1):
    """Pure-JAX f32 reference (lax conv) with identical spectral-norm scaling."""
    sigma = spectral_sigma(weight)
    w_sn = weight / sigma
    out = lax.conv_general_dilated(
        x_ncdhw, w_sn,
        window_strides=(stride, stride, stride),
        padding=[(padding, padding)] * 3,
        dimension_numbers=("NCDHW", "OIDHW", "NCDHW"),
    )
    out = out + bias.reshape(1, -1, 1, 1, 1)
    return jnp.where(out >= 0, out, LEAKY_SLOPE * out)


if __name__ == "__main__":
    key = jax.random.PRNGKey(0)
    k1, k2, k3 = jax.random.split(key, 3)

    # Small shapes consistent with a Conv3d: NCDHW input, OIDHW weight.
    B, Cin, Cout, D, H, W, k = 2, 4, 8, 4, 8, 8, 3
    x = jax.random.normal(k1, (B, Cin, D, H, W), jnp.float32)
    weight = jax.random.normal(k2, (Cout, Cin, k, k, k), jnp.float32) * 0.1
    bias = jax.random.normal(k3, (Cout,), jnp.float32) * 0.1

    out = jax.block_until_ready(vanilla_conv_forward(x, weight, bias, stride=1, padding=1))
    ref = jax.block_until_ready(_reference_forward(x, weight, bias, stride=1, padding=1))

    assert out.shape == ref.shape == (B, Cout, D, H, W)
    # bf16 matmul inputs + bf16 output store (f32 accumulation) -> loosened
    # tolerance vs the f32 reference.
    assert jnp.allclose(out, ref, rtol=5e-2, atol=5e-2), \
        f"max abs err {float(jnp.max(jnp.abs(out - ref)))}"

    print("KERNEL_OK")
</pallas_src>

<mosaic_0001>
module attributes {stable_mosaic.version = 11 : i64} {
  func.func @_fused_conv3d_kernel(%arg0: i32, %arg1: i32, %arg2: i32, %arg3: i32, %arg4: memref<1x1x64x36xbf16, #tpu.memory_space<vmem>>, %arg5: memref<3x36x128xbf16, #tpu.memory_space<vmem>>, %arg6: memref<1x128xf32, #tpu.memory_space<vmem>>, %arg7: memref<1x1x64x128xbf16, #tpu.memory_space<vmem>>, %arg8: memref<64x128xf32, #tpu.memory_space<vmem>>) attributes {dimension_semantics = [#tpu.dimension_semantics<parallel>, #tpu.dimension_semantics<parallel>, #tpu.dimension_semantics<parallel>, #tpu.dimension_semantics<arbitrary>], iteration_bounds = array<i64: 2, 4, 1, 3>, scalar_prefetch = 0 : i64, scratch_operands = 1 : i64, tpu.core_type = #tpu.core_type<tc>, window_params = [{transform_indices = @transform_0, window_bounds = array<i64: 1, 1, 64, 36>}, {pipeline_mode = #tpu.pipeline_mode<synchronous>, transform_indices = @transform_1, window_bounds = array<i64: 3, 36, 128>}, {pipeline_mode = #tpu.pipeline_mode<synchronous>, transform_indices = @transform_2, window_bounds = array<i64: 1, 128>}, {transform_indices = @transform_3, window_bounds = array<i64: 1, 1, 64, 128>}]} {
    %c0_i32 = arith.constant 0 : i32
    %0 = arith.cmpi eq, %arg3, %c0_i32 : i32
    %1 = arith.extui %0 : i1 to i32
    %c0_i32_0 = arith.constant 0 : i32
    %2 = arith.cmpi ne, %1, %c0_i32_0 : i32
    scf.if %2 {
      %cst_11 = arith.constant 0.000000e+00 : f32
      %15 = vector.broadcast %cst_11 : f32 to vector<64x128xf32>
      %c0_12 = arith.constant 0 : index
      %c0_13 = arith.constant 0 : index
      %16 = vector.load %arg8[%c0_12, %c0_13] : memref<64x128xf32, #tpu.memory_space<vmem>>, vector<64x128xf32>
      tpu.vector_store %arg8[%c0_12, %c0_13], %15 {strides = array<i32>} : memref<64x128xf32, #tpu.memory_space<vmem>>, vector<64x128xf32>,
    } else {
    }
    %c0 = arith.constant 0 : index
    %c0_1 = arith.constant 0 : index
    %3 = vector.load %arg8[%c0, %c0_1] : memref<64x128xf32, #tpu.memory_space<vmem>>, vector<64x128xf32>
    %c0_2 = arith.constant 0 : index
    %c0_3 = arith.constant 0 : index
    %c0_4 = arith.constant 0 : index
    %c0_5 = arith.constant 0 : index
    %4 = vector.load %arg4[%c0_2, %c0_3, %c0_4, %c0_5] : memref<1x1x64x36xbf16, #tpu.memory_space<vmem>>, vector<1x1x64x36xbf16>
    %5 = vector.shape_cast %4 : vector<1x1x64x36xbf16> to vector<64x36xbf16>
    %6 = arith.index_cast %arg3 : i32 to index
    %c0_6 = arith.constant 0 : index
    %c0_7 = arith.constant 0 : index
    %7 = vector.load %arg5[%6, %c0_6, %c0_7] : memref<3x36x128xbf16, #tpu.memory_space<vmem>>, vector<1x36x128xbf16>
    %8 = vector.shape_cast %7 : vector<1x36x128xbf16> to vector<36x128xbf16>
    %cst = arith.constant dense<0.000000e+00> : vector<64x128xf32>
    %9 = tpu.matmul %5, %8, %cst {dimension_numbers = #tpu.dot_dimension_numbers<[1], [0], [0], [1], [0, 0, 1, 1], [], []>} : vector<64x36xbf16>, vector<36x128xbf16>, vector<64x128xf32> -> vector<64x128xf32>
    %10 = arith.addf %3, %9 : vector<64x128xf32>
    %c0_8 = arith.constant 0 : index
    %c0_9 = arith.constant 0 : index
    %11 = vector.load %arg8[%c0_8, %c0_9] : memref<64x128xf32, #tpu.memory_space<vmem>>, vector<64x128xf32>
    tpu.vector_store %arg8[%c0_8, %c0_9], %10 {strides = array<i32>} : memref<64x128xf32, #tpu.memory_space<vmem>>, vector<64x128xf32>,
    %c2_i32 = arith.constant 2 : i32
    %12 = arith.cmpi eq, %arg3, %c2_i32 : i32
    %13 = arith.extui %12 : i1 to i32
    %c0_i32_10 = arith.constant 0 : i32
    %14 = arith.cmpi ne, %13, %c0_i32_10 : i32
    scf.if %14 {
      %c0_11 = arith.constant 0 : index
      %c0_12 = arith.constant 0 : index
      %15 = vector.load %arg8[%c0_11, %c0_12] : memref<64x128xf32, #tpu.memory_space<vmem>>, vector<64x128xf32>
      %c0_13 = arith.constant 0 : index
      %c0_14 = arith.constant 0 : index
      %16 = vector.load %arg6[%c0_13, %c0_14] : memref<1x128xf32, #tpu.memory_space<vmem>>, vector<1x128xf32>
      %17 = vector.broadcast %16 : vector<1x128xf32> to vector<64x128xf32>
      %18 = arith.addf %15, %17 : vector<64x128xf32>
      %cst_15 = arith.constant 0.000000e+00 : f32
      %19 = vector.broadcast %cst_15 : f32 to vector<64x128xf32>
      %20 = arith.cmpf oge, %18, %19 : vector<64x128xf32>
      %cst_16 = arith.constant 2.000000e-01 : f32
      %21 = vector.broadcast %cst_16 : f32 to vector<64x128xf32>
      %22 = arith.mulf %21, %18 : vector<64x128xf32>
      %23 = arith.select %20, %18, %22 : vector<64x128xi1>, vector<64x128xf32>
      %24 = arith.truncf %23 : vector<64x128xf32> to vector<64x128xbf16>
      %c0_17 = arith.constant 0 : index
      %c0_18 = arith.constant 0 : index
      %c0_19 = arith.constant 0 : index
      %c0_20 = arith.constant 0 : index
      %25 = vector.load %arg7[%c0_17, %c0_18, %c0_19, %c0_20] : memref<1x1x64x128xbf16, #tpu.memory_space<vmem>>, vector<1x1x64x128xbf16>
      %26 = vector.shape_cast %25 : vector<1x1x64x128xbf16> to vector<64x128xbf16>
      %27 = vector.shape_cast %24 : vector<64x128xbf16> to vector<1x1x64x128xbf16>
      tpu.vector_store %arg7[%c0_17, %c0_18, %c0_19, %c0_20], %27 {strides = array<i32>} : memref<1x1x64x128xbf16, #tpu.memory_space<vmem>>, vector<1x1x64x128xbf16>,
    } else {
    }
    return
  }
  func.func @transform_0(%arg0: i32, %arg1: i32, %arg2: i32, %arg3: i32) -> (i32, i32, i32, i32) {
    %0 = arith.addi %arg1, %arg3 : i32
    %c0_i32 = arith.constant 0 : i32
    %c0_i32_0 = arith.constant 0 : i32
    return %arg0, %0, %arg2, %c0_i32 : i32, i32, i32, i32
  }
  func.func @transform_1(%arg0: i32, %arg1: i32, %arg2: i32, %arg3: i32) -> (i32, i32, i32) {
    %c0_i32 = arith.constant 0 : i32
    %c0_i32_0 = arith.constant 0 : i32
    %c0_i32_1 = arith.constant 0 : i32
    %c0_i32_2 = arith.constant 0 : i32
    return %c0_i32, %c0_i32_0, %c0_i32_1 : i32, i32, i32
  }
  func.func @transform_2(%arg0: i32, %arg1: i32, %arg2: i32, %arg3: i32) -> (i32, i32) {
    %c0_i32 = arith.constant 0 : i32
    %c0_i32_0 = arith.constant 0 : i32
    %c0_i32_1 = arith.constant 0 : i32
    return %c0_i32, %c0_i32_0 : i32, i32
  }
  func.func @transform_3(%arg0: i32, %arg1: i32, %arg2: i32, %arg3: i32) -> (i32, i32, i32, i32) {
    %c0_i32 = arith.constant 0 : i32
    %c0_i32_0 = arith.constant 0 : i32
    return %arg0, %arg1, %arg2, %c0_i32 : i32, i32, i32, i32
  }
}

</mosaic_0001>

<bundles_post_ra>
// kernel: tpu_custom_call.1
= control target key start
LH: loop header
LB: loop body
LE: loop exit
PB: predicated region body
PF: predicated region fallthrough
CT: control target
= control target key end

     0   :  { %8 = vsyncpa [#allocation4], 0  ;;  %s1139_s0 = inlined_call_operand.vmem [shape: bf16[2,6,64,36], index: 0, kind: input, shape index: {}]   ;;  %s1140_s1 = inlined_call_operand.vmem [shape: bf16[3,36,128], index: 1, kind: input, shape index: {}]   ;;  %s1141_s2 = inlined_call_operand.vmem [shape: f32[1,128], index: 2, kind: input, shape index: {}]   ;;  %s1142_s3 = inlined_call_operand.hbm [shape: bf16[2,4,64,128], index: 3, kind: output, shape index: {}]  }
   0x1   :  { %10 = vsyncpa [#allocation4 + $0x1], 0  ;;  %s949_s12 = smov 0   ;;  %s951_s13 = smov 0  }
   0x2   :  { %s953_s14 = smov 0   ;;  %s955_s15 = smov 0  }
   0x3   :  { %s957_s16 = smov 0   ;;  %s959_s17 = smov 0  }
   0x4   :  { %s961_s18 = smov 0   ;;  %s963_s19 = smov 0  }
   0x5   :  { %s965_s20 = smov 0   ;;  %s967_s21 = smov 0  }
   0x6 LB: > { %s617_s22 = sadd.s32 4294967295, %s923_s21   ;;  %s618_s23 = sadd.s32 4294967294, %s923_s21   ;;  %s923_s21 = sphi %s967_s21, %s16_s21   ;;  %s919_s20 = sphi %s965_s20, %s1156_s20   ;;  %s915_s19 = sphi %s963_s19, %s1155_s19   ;;  %s911_s18 = sphi %s961_s18, %s1154_s18   ;;  %s907_s17 = sphi %s959_s17, %s1153_s17   ;;  %s903_s16 = sphi %s957_s16, %s1152_s16   ;;  %s899_s15 = sphi %s955_s15, %s1151_s15   ;;  %s895_s14 = sphi %s953_s14, %s1150_s14   ;;  %s891_s13 = sphi %s951_s13, %s1149_s13   ;;  %s887_s12 = sphi %s949_s12, %s1148_s12  }
   0x7   : > { %s31_s24 = sadd.s32 1, %s911_s18  ;;  %s38_s25 = sadd.s32 1, %s915_s19 }
   0x8   : > { %p32_p0 = scmp.ge.s32.totalorder %s31_s24, 3  ;;  %s42_s26 = sadd.s32 1, %s919_s20 }
   0x9   : > { %p137_p1 = scmp.ne.s32.totalorder %s895_s14, %s891_s13  ;;  %p138_p2 = scmp.eq.s32.totalorder %s617_s22, 23 }
   0xa   : > { %s1158_s24 = smov (%p32_p0, %s31_s24), 0  ;;  %s1160_s25 = smov (!%p32_p0, %s38_s25), %s915_s19 }
   0xb   : > { %p143_p3 = scmp.ne.s32.totalorder %s891_s13, %s887_s12  ;;  %p40_p4 = scmp.ge.s32.totalorder %s1160_s25, 4 }
   0xc   : > { %p144_p5 = scmp.eq.s32.totalorder %s618_s23, 23  ;;  %p1011_p6 = por %p138_p2, %p137_p1 }
   0xd   : > { %s1162_s25 = smov (%p40_p4, %s1160_s25), 0  ;;  %s1164_s26 = smov (!%p40_p4, %s42_s26), %s919_s20 }
   0xe   : > { %p1018_p7 = por %p144_p5, %p143_p3  ;;  %p621_p8 = scmp.ge.s32.totalorder %s923_s21, 1 }
   0xf   : > { %p44_p9 = scmp.ge.s32.totalorder %s1164_s26, 2  ;;  %p187_p10 = scmp.lt.s32.totalorder %s923_s21, 25 }
  0x10   : > { %s121_s29 = ssub.s32 %s915_s19, %s1162_s25  ;;  %s127_s5 = sadd.s32 1, %s895_s14 }
  0x11   : > { %s1166_s26 = smov (%p44_p9, %s1164_s26), 0  ;;  %p188_p11 = pnand %p621_p8, %p187_p10 }
  0x12   : > { %1146 = sst [smem:[#allocation6_spill]] %s1166_s26  ;;  %s120_s30 = ssub.s32 %s919_s20, %s1166_s26 }
  0x13   : > { %s122_s4 = sor.u32 %s121_s29, %s120_s30  ;;  %191 = sbr.rel (%p188_p11) target bundleno = 314 (0x13a), region = 32 }
  0x14   : > { %p125_p12 = scmp.eq.s32.totalorder %s122_s4, 0  ;;  %s217_s7 = sand.u32 (!%p188_p11), 1, %s891_s13  }
  0x15   : > { %s220_s8 = sadd.s32 (!%p188_p11), %s899_s15, %s903_s16  ;;  %s622_s9 = sshll.u32 (!%p188_p11), %s217_s7, 5 }
  0x16   : > { %s1032_s6 = scalar_select %p125_p12, %s895_s14, %s127_s5  }
  0x17   : > { %p222_p13 = scmp.lt.s32.totalorder (!%p188_p11), %s907_s17, 1  ;;  %p224_p0 = scmp.lt.s32.totalorder (!%p188_p11), %s220_s8, 5 }
  0x18   : > { %s1046_s26 = scalar_lea.vmem (!%p188_p11), [#allocation3], %s622_s9  ;;  %p625_p1 = scmp.ne.s32.totalorder (!%p188_p11), %s899_s15, 0 }
  0x1a   : > { %s223_s10 = scalar_select %p222_p13, %s907_s17, 1 }
  0x1b   : > { %s1168_s8 = smov (!%p224_p0, %s220_s8), 5  ;;  %241 = sbr.rel (%p625_p1) target bundleno = 34 (0x22), region = 36 }
  0x1c   : > { %s715_s11 = smul.u32 48, %s223_s10  ;;  %s623_s22 = sshll.u32 %s1168_s8, 3  ;;  %v925_v0 = vmov (!%p625_p1), 0.0  }
  0x1d   : > { %242 = vst [vmem:[#allocation2] sm:$0xff] (!%p625_p1), %v925_v0  ;;  %243 = vst [vmem:[#allocation2 + $0x8] sm:$0xff] (!%p625_p1), %v925_v0 }
  0x1e   : > { %s231_s23 = sadd.s32 %s715_s11, %s623_s22  ;;  %244 = vst [vmem:[#allocation2 + $0x10] sm:$0xff] (!%p625_p1), %v925_v0  ;;  %245 = vst [vmem:[#allocation2 + $0x18] sm:$0xff] (!%p625_p1), %v925_v0 }
  0x1f   : > { %s624_s29 = sshll.u32 %s231_s23, 2  ;;  %246 = vst [vmem:[#allocation2 + $0x20] sm:$0xff] (!%p625_p1), %v925_v0  ;;  %247 = vst [vmem:[#allocation2 + $0x28] sm:$0xff] (!%p625_p1), %v925_v0 }
  0x20   : > { %s1044_s5 = scalar_lea.vmem %s1139_s0, %s624_s29  ;;  %248 = vst [vmem:[#allocation2 + $0x30] sm:$0xff] (!%p625_p1), %v925_v0  ;;  %249 = vst [vmem:[#allocation2 + $0x38] sm:$0xff] (!%p625_p1), %v925_v0 }
  0x22 PF: > { %s654_s8 = smul.u32 20, %s899_s15  ;;  %v809_v1 = vld [vmem:[%s1044_s5] sm:$0xff]   ;;  %vm309_vm0 = vcmask 293888   ;;  %v810_v2 = vld [vmem:[%s1044_s5 + $0x10] sm:$0xff]   ;;  %vm322_vm1 = vcmask 1041408   ;;  %v811_v7 = vld [vmem:[%s1044_s5 + $0x8] sm:$0xff]  }
  0x23   : > { %699 = vmatprep.mubr.msk.bf16.mxu0 %vm309_vm0, %v809_v1  ;;  %703 = vmatprep.mubr.msk.bf16.mxu1 %vm309_vm0, %v810_v2  ;;  %v812_v8 = vld [vmem:[%s1044_s5 + $0x18] sm:$0xff]   ;;  %p638_p2 = scmp.ne.s32.totalorder %s899_s15, 2 }
  0x24   : > { %s268_s11 = scalar_lea.vmem %s1140_s1, %s654_s8  ;;  %v250_v11 = vld [vmem:[#allocation2] sm:$0xff]  ;;  %v251_v21 = vld [vmem:[#allocation2 + $0x8] sm:$0xff] }
  0x25   : > { %v806_v3 = vld [vmem:[%s268_s11] sm:$0xff]   ;;  %v807_v4 = vld [vmem:[%s268_s11 + $0x8] sm:$0xff]   ;;  %v808_v5 = vld [vmem:[%s268_s11 + $0x10] ss:$0 sps:$4 sm:$0x33]  }
  0x26   : > { %693 = vmatprep.subr.bf16.mxu0 %v806_v3  ;;  %707 = vmatprep.subr.bf16.mxu1 %v806_v3  ;;  %v324_v6 = vsel %vm322_vm1, %v808_v5, 0  ;;  %v252_v9 = vld [vmem:[#allocation2 + $0x10] sm:$0xff]  ;;  %v254_v12 = vld [vmem:[#allocation2 + $0x20] sm:$0xff]  ;;  %v253_v15 = vld [vmem:[#allocation2 + $0x18] sm:$0xff] }
  0x27   : > { %694 = vmatpush3.bf16.msra.mxu0 %v806_v3  ;;  %710 = vmatpush3.bf16.msra.mxu1 %v806_v3  ;;  %v256_v10 = vld [vmem:[#allocation2 + $0x30] sm:$0xff]  ;;  %v257_v16 = vld [vmem:[#allocation2 + $0x38] sm:$0xff]  ;;  %v255_v22 = vld [vmem:[#allocation2 + $0x28] sm:$0xff] }
  0x28   : > { %695 = vmatprep.subr.bf16.mxu0 %v807_v4  ;;  %708 = vmatprep.subr.bf16.mxu1 %v807_v4  ;;  %v639_v35 = vld [vmem:[%s1141_s2] ss:$0 sm:$0xff] (!%p638_p2) }
  0x2b   : > { %696 = vmatpush3.bf16.msra.mxu0 %v807_v4  ;;  %711 = vmatpush3.bf16.msra.mxu1 %v807_v4 }
  0x2c   : > { %713 = vmatprep.subr.msk.bf16.mxu0 %vm322_vm1, %v808_v5  ;;  %714 = vmatprep.subr.msk.bf16.mxu1 %vm322_vm1, %v808_v5 }
  0x2f   : > { %698 = vmatpush3.bf16.msra.mxu0 %v324_v6  ;;  %712 = vmatpush3.bf16.msra.mxu1 %v324_v6 }
  0x32   : > { %700 = vmatmul.mubr.msk.bf16.vlgmr.msra.gmra.mrb[0].mxu0 %vm309_vm0, %v811_v7  ;;  %704 = vmatmul.mubr.msk.bf16.vlgmr.msra.gmra.mrb[0].mxu1 %vm309_vm0, %v812_v8 }
 0x105   : > { %v701_v13 = vpop.f32.mrb[0].mxu0  ;;  %v705_v14 = vpop.f32.mrb[0].mxu1  ;;  %410 = sbr.rel (%p638_p2) target bundleno = 287 (0x11f), region = 40 }
 0x106   : > { %v393_v17 = vadd.f32 %v701_v13, %v252_v9  ;;  %v397_v18 = vadd.f32 %v705_v14, %v256_v10  ;;  %v360_v19 = vpop.f32.mrb[1].mxu0  ;;  %v376_v20 = vpop.f32.mrb[1].mxu1 }
 0x107   : > { %v391_v23 = vadd.f32 %v360_v19, %v250_v11  ;;  %v395_v24 = vadd.f32 %v376_v20, %v254_v12  ;;  %v702_v25 = vpop.f32.mrb[2].mxu0  ;;  %v706_v26 = vpop.f32.mrb[2].mxu1 }
 0x108   : > { %401 = vst [vmem:[#allocation2 + $0x10] sm:$0xff] %v393_v17  ;;  %405 = vst [vmem:[#allocation2 + $0x30] sm:$0xff] %v397_v18  ;;  %v394_v27 = vadd.f32 %v702_v25, %v253_v15  ;;  %v398_v28 = vadd.f32 %v706_v26, %v257_v16  ;;  %v363_v29 = vpop.f32.mrb[3].mxu0  ;;  %v379_v30 = vpop.f32.mrb[3].mxu1 }
 0x109   : > { %399 = vst [vmem:[#allocation2] sm:$0xff] %v391_v23  ;;  %403 = vst [vmem:[#allocation2 + $0x20] sm:$0xff] %v395_v24  ;;  %v392_v31 = vadd.f32 %v363_v29, %v251_v21  ;;  %v396_v32 = vadd.f32 %v379_v30, %v255_v22 }
 0x10a   : > { %402 = vst [vmem:[#allocation2 + $0x18] sm:$0xff] %v394_v27  ;;  %406 = vst [vmem:[#allocation2 + $0x38] sm:$0xff] %v398_v28 }
 0x10b   : > { %400 = vst [vmem:[#allocation2 + $0x8] sm:$0xff] %v392_v31  ;;  %404 = vst [vmem:[#allocation2 + $0x28] sm:$0xff] %v396_v32 }
 0x10f   : > { %v413_v38 = vld [vmem:[#allocation2 + $0x10] sm:$0xff] }
 0x110   : > { %v411_v33 = vld [vmem:[#allocation2] sm:$0xff]  ;;  %v428_v41 = vadd.f32 %v639_v35, %v413_v38  ;;  %v417_v45 = vld [vmem:[#allocation2 + $0x30] sm:$0xff] }
 0x111   : > { %v426_v36 = vadd.f32 %v639_v35, %v411_v33  ;;  %v414_v39 = vld [vmem:[#allocation2 + $0x18] sm:$0xff]  ;;  %v415_v40 = vld [vmem:[#allocation2 + $0x20] sm:$0xff]  ;;  %v432_v60 = vadd.f32 %v639_v35, %v417_v45 }
 0x112   : > { %v412_v34 = vld [vmem:[#allocation2 + $0x8] sm:$0xff]  ;;  %v429_v42 = vadd.f32 %v639_v35, %v414_v39  ;;  %v430_v44 = vadd.f32 %v639_v35, %v415_v40  ;;  %vm436_vm4 = vcmp.ge.f32.partialorder %v428_v41, 0.0  ;;  %v444_v48 = vmul.f32 0.2, %v428_v41  ;;  %v418_v53 = vld [vmem:[#allocation2 + $0x38] sm:$0xff] }
 0x113   : > { %v427_v37 = vadd.f32 %v639_v35, %v412_v34  ;;  %v416_v43 = vld [vmem:[#allocation2 + $0x28] sm:$0xff]  ;;  %vm434_vm2 = vcmp.ge.f32.partialorder %v426_v36, 0.0  ;;  %v442_v46 = vmul.f32 0.2, %v426_v36  ;;  %v433_v62 = vadd.f32 %v639_v35, %v418_v53 }
 0x114   : > { %vm437_vm5 = vcmp.ge.f32.partialorder %v429_v42, 0.0  ;;  %v445_v49 = vmul.f32 0.2, %v429_v42  ;;  %v431_v52 = vadd.f32 %v639_v35, %v416_v43  ;;  %vm438_vm6 = vcmp.ge.f32.partialorder %v430_v44, 0.0 }
 0x115   : > { %vm435_vm3 = vcmp.ge.f32.partialorder %v427_v37, 0.0  ;;  %v443_v47 = vmul.f32 0.2, %v427_v37  ;;  %v450_v50 = vsel %vm434_vm2, %v426_v36, %v442_v46  ;;  %v452_v55 = vsel %vm436_vm4, %v428_v41, %v444_v48 }
 0x116   : > { %v453_v56 = vsel %vm437_vm5, %v429_v42, %v445_v49  ;;  %v446_v57 = vmul.f32 0.2, %v430_v44  ;;  %vm439_vm7 = vcmp.ge.f32.partialorder %v431_v52, 0.0  ;;  %v447_v59 = vmul.f32 0.2, %v431_v52 }
 0x117   : > { %v451_v51 = vsel %vm435_vm3, %v427_v37, %v443_v47  ;;  %v671_v58 = vpack.c.bf16 %v453_v56, %v452_v55  ;;  %vm440_vm8 = vcmp.ge.f32.partialorder %v432_v60, 0.0  ;;  %v448_v0 = vmul.f32 0.2, %v432_v60 }
 0x118   : > { %v666_v54 = vpack.c.bf16 %v451_v51, %v450_v50  ;;  %v454_v61 = vsel %vm438_vm6, %v430_v44, %v446_v57  ;;  %v455_v63 = vsel %vm439_vm7, %v431_v52, %v447_v59  ;;  %vm441_vm9 = vcmp.ge.f32.partialorder %v433_v62, 0.0 }
 0x119   : > { %683 = vst [vmem:[%s1046_s26 + $0x8] sm:$0xff] %v671_v58   ;;  %v676_v1 = vpack.c.bf16 %v455_v63, %v454_v61  ;;  %v449_v2 = vmul.f32 0.2, %v433_v62  ;;  %v456_v3 = vsel %vm440_vm8, %v432_v60, %v448_v0 }
 0x11a   : > { %667 = vst [vmem:[%s1046_s26] sm:$0xff] %v666_v54  }
 0x11b   : > { %684 = vst [vmem:[%s1046_s26 + $0x10] sm:$0xff] %v676_v1   ;;  %v457_v4 = vsel %vm441_vm9, %v433_v62, %v449_v2 }
 0x11c   : > { %v681_v5 = vpack.c.bf16 %v457_v4, %v456_v3 }
 0x11e   : > { %685 = vst [vmem:[%s1046_s26 + $0x18] sm:$0xff] %v681_v5  }
 0x11f PF: > { %s649_s15 = sshll.u32 %s903_s16, 3  ;;  %s650_s29 = sshll.u32 %s907_s17, 5 }
 0x120   : > { %s516_s30 = sshll.u32 %s1046_s26, 4  ;;  %s513_s4 = sadd.s32 %s650_s29, %s649_s15  ;;  %s1072_s30 = int_to_ptr.vmem [resolvable:$true] %s516_s30 }
 0x121   : > { %s651_s5 = sshll.u32 %s513_s4, 6  ;;  %s1081_s11 = scalar_lea.sflag [#allocation4], %s217_s7 }
 0x122   : > { %s1077_s10 = scalar_lea.hbm %s1142_s3, %s651_s5  ;;  %s813_s22 = scalar_lea.vmem %s1072_s30, 512 }
 0x123   : > { %p814_p3 = scmp.ne.s32.totalorder %s1072_s30, %s813_s22  ;;  %s926_s16 = smov [#allocation3]  }
 0x124   : > { %s817_s17 = sshll.u32 %s926_s16, 4  ;;  %s818_s17 = int_to_ptr.vmem [resolvable:$false] %s817_s17 }
 0x125   : > { %p815_p4 = pnand %p814_p3, %p1011_p6  ;;  %s819_s26 = scalar_lea.vmem %s818_s17, 1024 }
 0x126   : > { %p820_p8 = scmp.lt.s32.totalorder %s1072_s30, %s818_s17  ;;  %p821_p9 = scmp.lt.s32.totalorder %s819_s26, %s813_s22 }
 0x127   : > { %p816_p5 = pneg %p815_p4 }
 0x128   : > { %p822_p10 = por %p821_p9, %p820_p8 }
 0x12a   : > { %p823_p11 = pnand %p822_p10, %p816_p5 }
 0x12c   : > { %826 = shalt.err (!%p823_p11)
}
 0x12d   : > { %s827_s7 = scalar_lea.hbm %s1077_s10, 512  ;;  %s831_s29 = scalar_lea.hbm %s1142_s3, 4096 }
 0x12e   : > { %p828_p12 = scmp.ne.s32.totalorder %s1077_s10, %s827_s7  ;;  %p832_p1 = scmp.lt.u32.totalorder %s1077_s10, %s1142_s3 }
 0x12f   : > { %p833_p2 = scmp.lt.u32.totalorder %s831_s29, %s827_s7  ;;  %p835_p4 = scmp.lt.u32.totalorder %s827_s7, %s1077_s10 }
 0x130   : > { %p829_p13 = pnand %p828_p12, %p1011_p6 }
 0x131   : > { %p834_p3 = por %p833_p2, %p832_p1 }
 0x132   : > { %p830_p0 = pneg %p829_p13 }
 0x133   : > { %p836_p5 = por %p835_p4, %p834_p3 }
 0x135   : > { %p837_p8 = pnand %p836_p5, %p830_p0 }
 0x137   : > { %840 = shalt.err (!%p837_p8)
}
 0x138   : > { %s927_s8 = smov 64   ;;  %s928_s9 = smov 4  }
 0x139   : > { %716 = dma.vmem_to_hbm [thread:$0]  (%p1011_p6), %s1072_s30, 512, %s1077_s10, %s1081_s11, %s927_s8, %s927_s8, %s928_s9  }
 0x13a PF: > { %p722_p9 = scmp.ge.s32.totalorder %s923_s21, 2  ;;  %s531_s22 = sand.u32 1, %s887_s12  }
 0x13b   : > { %s532_s16 = scalar_lea.sflag [#allocation4], %s531_s22 }
 0x13c   : > { %p719_p10 = pnand %p722_p9, %p1018_p7 }
 0x13e   : > { %882 = dma.done.wait (!%p719_p10), %s532_s16, 512  }
 0x13f   : > { %884 = vsyncadd (!%p719_p10), %s532_s16, 4294966784  ;;  %s16_s21 = sadd.s32 1, %s923_s21   ;;  %s1147_s27 = sld [smem:[#allocation6_spill]] }
 0x140   : > { %p13_p11 = scmp.ge.s32.totalorder %s16_s21, 26   ;;  %s1148_s12 = smov %s891_s13 }
 0x141   : > { %s1149_s13 = smov %s895_s14  ;;  %s1150_s14 = smov %s1032_s6 }
 0x142   : > { %s1151_s15 = smov %s911_s18  ;;  %s1152_s16 = smov %s915_s19 }
 0x143   : > { %s1153_s17 = smov %s919_s20  ;;  %s1154_s18 = smov %s1158_s24 }
 0x144   : > { %s1155_s19 = smov %s1162_s25  ;;  %15 = sbr.rel (!%p13_p11) target bundleno = 6 (0x6), region = 76 }
 0x145   : > { %s1156_s20 = smov %s1147_s27 }
 0x14b   :  { %537 = vsyncpa [#allocation4], 1 }
 0x14c   :  { %539 = vsyncpa [#allocation4 + $0x1], 1 }

</bundles_post_ra>
